<compile_context>
chip_gen: v7x
topology: tpu7x:2x2x1
jax: 0.10.0
libtpu: 0.0.40
codegen_flags: <defaults>
</compile_context>

<pallas_src>
import jax
import jax.numpy as jnp
import numpy as np
from jax.experimental import pallas as pl
from jax.experimental.pallas import tpu as pltpu

LANES = 128


def _round_up(x, m):
    return ((x + m - 1) // m) * m


def _vmem_capacity_bytes():
    # Hardware-aware sizing: 128 MiB on v5e/v6e, 64 MiB per TC on v7x.
    try:
        return int(pltpu.get_tpu_info().vmem_capacity_bytes)
    except Exception:
        return 64 * 1024 * 1024   # conservative (v7x-sized) fallback


# ------------------------------ Pallas kernels -------------------------------

def _conv_bn_stats_kernel(a_ref, b_ref, y_ref, stats_ref):
    """One M-tile of conv-as-matmul with a fused BN-statistics epilogue.

    a_ref:     (tm, Kpad)    bf16 im2col patch rows
    b_ref:     (Kpad, Cpad)  bf16 weight (Cout zero-padded to 128 lanes)
    y_ref:     (tm, Cpad)    bf16 conv output tile (half-width HBM traffic)
    stats_ref: (1, 2, Cpad)  f32 per-tile [sum; sum-of-squares] over rows
    """
    y = jnp.dot(a_ref[...], b_ref[...], preferred_element_type=jnp.float32)
    y_ref[...] = y.astype(y_ref.dtype)
    # BN partial stats from the f32 tile while it is still in VMEM.
    s = jnp.sum(y, axis=0, keepdims=True)          # (1, Cpad)
    sq = jnp.sum(y * y, axis=0, keepdims=True)     # (1, Cpad)
    stats_ref[...] = jnp.concatenate([s, sq], axis=0)[None]


def _bn_relu_kernel(y_ref, scale_ref, shift_ref, o_ref):
    # Fused affine-normalize + ReLU; bf16 y read, f32 math, f32 output.
    y = y_ref[...].astype(jnp.float32)
    o_ref[...] = jnp.maximum(y * scale_ref[...] + shift_ref[...], 0.0)


# --------------------------------- wrapper -----------------------------------

def basic_conv2d(x, weight, gamma, beta, *, stride=1, padding=1, eps=1e-3):
    """x: (N, Cin, H, W) f32; weight: (Cout, Cin, kh, kw) f32 (PyTorch OIHW)."""
    N, Cin, H, W = x.shape
    Cout, _, kh, kw = weight.shape
    Hout = (H + 2 * padding - kh) // stride + 1
    Wout = (W + 2 * padding - kw) // stride + 1
    M = N * Hout * Wout
    K = Cin * kh * kw

    Cpad = _round_up(Cout, LANES)      # lane-dense output channels
    Kpad = _round_up(K, 16)            # friendly bf16 sublane count

    # --- patch extraction (JAX glue).  Cast to bf16 FIRST so the 9x-sized
    # im2col tensor materializes once, in bf16.  NHWC so per-tap slices are
    # already (N, Hout, Wout, Cin) and the K-order (Cin, kh, kw) matches the
    # OIHW weight flattening.
    # TODO(synk): an implicit GEMM (in-kernel shifted-window DMA, no
    # materialized patches) is not expressible with Blocked BlockSpecs for
    # arbitrary stride; the patch gather stays in XLA.
    x_nhwc = jnp.transpose(x, (0, 2, 3, 1)).astype(jnp.bfloat16)
    xp = jnp.pad(x_nhwc,
                 ((0, 0), (padding, padding), (padding, padding), (0, 0)))
    taps = []
    for dy in range(kh):
        for dx in range(kw):
            taps.append(xp[:, dy:dy + stride * Hout:stride,
                           dx:dx + stride * Wout:stride, :])
    # (N, Hout, Wout, Cin, kh*kw) -> (M, K); K order (Cin, kh, kw) == OIHW flatten
    a = jnp.stack(taps, axis=-1).reshape(M, K)

    # --- adaptive M tiling.
    vmem_budget = min(_vmem_capacity_bytes() // 2, 80 * 1024 * 1024)
    # Double-buffered per-row VMEM bytes: pass 1 = a(bf16)+y(bf16),
    # pass 2 = y(bf16)+out(f32); take the max so both passes fit.
    per_row = 2 * max((Kpad + Cpad) * 2, Cpad * (2 + 4))
    resident = 2 * Kpad * Cpad * 2 + 2 * (2 * Cpad * 4) + 4 * Cpad * 4
    avail = max(vmem_budget - resident - (1 << 20), per_row * 64)
    tm_cap = int(min(4096, max(256, (avail // per_row) // 8 * 8)))

    # >= 4 tiles: both v7x TensorCores get work ("parallel" M axis) and the
    # auto-pipeline actually overlaps DMA with compute, while tm tracks
    # cdiv(M, grid_m) so M-padding waste is bounded.
    grid_m = max(4, pl.cdiv(M, tm_cap))
    tm = max(8, _round_up(pl.cdiv(M, grid_m), 8))
    M_pad = grid_m * tm

    a = jnp.pad(a, ((0, M_pad - M), (0, Kpad - K)))   # already bf16

    b = weight.reshape(Cout, K).T.astype(jnp.float32)            # (K, Cout)
    b = jnp.pad(b, ((0, Kpad - K), (0, Cpad - Cout))).astype(jnp.bfloat16)

    vmem_limit = int(min(_vmem_capacity_bytes() * 3 // 4,
                         vmem_budget + 16 * 1024 * 1024))
    cparams = pltpu.CompilerParams(
        dimension_semantics=("parallel",),
        vmem_limit_bytes=vmem_limit)

    # --- pass 1: conv matmul + fused BN partial statistics (one pass over y).
    ce1 = pl.CostEstimate(
        flops=2 * M_pad * Kpad * Cpad,
        transcendentals=0,
        bytes_accessed=(M_pad * Kpad * 2 + Kpad * Cpad * 2
                        + M_pad * Cpad * 2 + grid_m * 2 * Cpad * 4))
    y, stats_p = pl.pallas_call(
        _conv_bn_stats_kernel,
        out_shape=(jax.ShapeDtypeStruct((M_pad, Cpad), jnp.bfloat16),
                   jax.ShapeDtypeStruct((grid_m, 2, Cpad), jnp.float32)),
        grid_spec=pltpu.PrefetchScalarGridSpec(
            num_scalar_prefetch=0,
            grid=(grid_m,),
            in_specs=[pl.BlockSpec((tm, Kpad), lambda i: (i, 0)),
                      pl.BlockSpec((Kpad, Cpad), lambda i: (0, 0))],
            out_specs=(pl.BlockSpec((tm, Cpad), lambda i: (i, 0)),
                       pl.BlockSpec((1, 2, Cpad), lambda i: (i, 0, 0)))),
        compiler_params=cparams,
        cost_estimate=ce1,
    )(a, b)

    # --- finish BN statistics: tiny (grid_m, 2, Cpad) reduction in plain JAX.
    stats = jnp.sum(stats_p, axis=0)                 # (2, Cpad)
    mean = stats[0] / M
    var = jnp.maximum(stats[1] / M - mean * mean, 0.0)   # biased var (PyTorch BN fwd)
    # TODO(synk): single-pass E[y^2]-E[y]^2 can cancel for very large M; switch
    # to a Welford-style combine of per-tile (count, mean, M2) if needed.
    gamma_p = jnp.pad(gamma.astype(jnp.float32), (0, Cpad - Cout))
    beta_p = jnp.pad(beta.astype(jnp.float32), (0, Cpad - Cout))
    scale = gamma_p / jnp.sqrt(var + eps)
    shift = beta_p - mean * scale
    scale = scale.reshape(1, Cpad)
    shift = shift.reshape(1, Cpad)

    # --- pass 2: fused normalize + ReLU (second and last pass over y).
    ce2 = pl.CostEstimate(
        flops=3 * M_pad * Cpad,
        transcendentals=0,
        bytes_accessed=M_pad * Cpad * 2 + M_pad * Cpad * 4 + 2 * Cpad * 4)
    out_flat = pl.pallas_call(
        _bn_relu_kernel,
        out_shape=jax.ShapeDtypeStruct((M_pad, Cpad), jnp.float32),
        grid_spec=pltpu.PrefetchScalarGridSpec(
            num_scalar_prefetch=0,
            grid=(grid_m,),
            in_specs=[pl.BlockSpec((tm, Cpad), lambda i: (i, 0)),
                      pl.BlockSpec((1, Cpad), lambda i: (0, 0)),
                      pl.BlockSpec((1, Cpad), lambda i: (0, 0))],
            out_specs=pl.BlockSpec((tm, Cpad), lambda i: (i, 0))),
        compiler_params=cparams,
        cost_estimate=ce2,
    )(y, scale, shift)

    # back to NCHW f32 (public API matches the PyTorch module)
    out = out_flat[:M, :Cout].reshape(N, Hout, Wout, Cout).transpose(0, 3, 1, 2)
    return out


# ----------------------------- plain-JAX reference ---------------------------

def _reference(x, weight, gamma, beta, *, stride=1, padding=1, eps=1e-3):
    y = jax.lax.conv_general_dilated(
        x, weight, window_strides=(stride, stride),
        padding=[(padding, padding), (padding, padding)],
        dimension_numbers=("NCHW", "OIHW", "NCHW"))
    mean = jnp.mean(y, axis=(0, 2, 3), keepdims=True)
    var = jnp.mean((y - mean) ** 2, axis=(0, 2, 3), keepdims=True)
    yhat = (y - mean) / jnp.sqrt(var + eps)
    yhat = yhat * gamma.reshape(1, -1, 1, 1) + beta.reshape(1, -1, 1, 1)
    return jnp.maximum(yhat, 0.0)


# ----------------------------------- main -------------------------------------

if __name__ == "__main__":
    key = jax.random.PRNGKey(0)
    kx, kw_ = jax.random.split(key)

    N, Cin, H, W = 2, 4, 16, 16
    Cout, kh, kw = 8, 3, 3          # BasicConv2d(4, 8, kernel_size=3, padding=1)

    x = jax.random.normal(kx, (N, Cin, H, W), dtype=jnp.float32)
    fan_in = Cin * kh * kw
    bound = 1.0 / np.sqrt(fan_in)   # kaiming-uniform-style deterministic init
    weight = jax.random.uniform(kw_, (Cout, Cin, kh, kw), jnp.float32,
                                minval=-bound, maxval=bound)
    gamma = jnp.ones((Cout,), jnp.float32)   # BatchNorm2d default init
    beta = jnp.zeros((Cout,), jnp.float32)

    out = basic_conv2d(x, weight, gamma, beta, stride=1, padding=1, eps=1e-3)
    out = jax.block_until_ready(out)

    ref = _reference(x, weight, gamma, beta, stride=1, padding=1, eps=1e-3)
    # Tolerance accounts for bf16 MXU operands and the bf16 round-trip of y
    # (f32 accumulation, f32 BN math); observed error is ~1e-2 after BN.
    np.testing.assert_allclose(np.asarray(out), np.asarray(ref),
                               rtol=1e-2, atol=3e-2)
    print("KERNEL_OK")
</pallas_src>

<mosaic_0001>
module attributes {stable_mosaic.version = 11 : i64} {
  func.func @_conv_bn_stats_kernel(%arg0: i32, %arg1: memref<128x48xbf16, #tpu.memory_space<vmem>>, %arg2: memref<48x128xbf16, #tpu.memory_space<vmem>>, %arg3: memref<128x128xbf16, #tpu.memory_space<vmem>>, %arg4: memref<1x2x128xf32, #tpu.memory_space<vmem>>) attributes {dimension_semantics = [#tpu.dimension_semantics<parallel>], iteration_bounds = array<i64: 4>, scalar_prefetch = 0 : i64, scratch_operands = 0 : i64, tpu.core_type = #tpu.core_type<tc>, window_params = [{transform_indices = @transform_0, window_bounds = array<i64: 128, 48>}, {pipeline_mode = #tpu.pipeline_mode<synchronous>, transform_indices = @transform_1, window_bounds = array<i64: 48, 128>}, {transform_indices = @transform_2, window_bounds = array<i64: 128, 128>}, {transform_indices = @transform_3, window_bounds = array<i64: 1, 2, 128>}]} {
    %c0 = arith.constant 0 : index
    %c0_0 = arith.constant 0 : index
    %0 = vector.load %arg1[%c0, %c0_0] : memref<128x48xbf16, #tpu.memory_space<vmem>>, vector<128x48xbf16>
    %c0_1 = arith.constant 0 : index
    %c0_2 = arith.constant 0 : index
    %1 = vector.load %arg2[%c0_1, %c0_2] : memref<48x128xbf16, #tpu.memory_space<vmem>>, vector<48x128xbf16>
    %cst = arith.constant dense<0.000000e+00> : vector<128x128xf32>
    %2 = tpu.matmul %0, %1, %cst {dimension_numbers = #tpu.dot_dimension_numbers<[1], [0], [0], [1], [0, 0, 1, 1], [], []>} : vector<128x48xbf16>, vector<48x128xbf16>, vector<128x128xf32> -> vector<128x128xf32>
    %3 = arith.truncf %2 : vector<128x128xf32> to vector<128x128xbf16>
    %c0_3 = arith.constant 0 : index
    %c0_4 = arith.constant 0 : index
    %4 = vector.load %arg3[%c0_3, %c0_4] : memref<128x128xbf16, #tpu.memory_space<vmem>>, vector<128x128xbf16>
    tpu.vector_store %arg3[%c0_3, %c0_4], %3 {strides = array<i32>} : memref<128x128xbf16, #tpu.memory_space<vmem>>, vector<128x128xbf16>,
    %cst_5 = arith.constant dense<0.000000e+00> : vector<128xf32>
    %5 = vector.multi_reduction <add>, %2, %cst_5 [0] : vector<128x128xf32> to vector<128xf32>
    %6 = vector.shape_cast %5 : vector<128xf32> to vector<1x128xf32>
    %7 = arith.mulf %2, %2 : vector<128x128xf32>
    %cst_6 = arith.constant dense<0.000000e+00> : vector<128xf32>
    %8 = vector.multi_reduction <add>, %7, %cst_6 [0] : vector<128x128xf32> to vector<128xf32>
    %9 = vector.shape_cast %8 : vector<128xf32> to vector<1x128xf32>
    %10 = tpu.concatenate %6, %9 in 0 : vector<1x128xf32>, vector<1x128xf32> -> vector<2x128xf32>
    %11 = vector.shape_cast %10 : vector<2x128xf32> to vector<1x2x128xf32>
    %c0_7 = arith.constant 0 : index
    %c0_8 = arith.constant 0 : index
    %c0_9 = arith.constant 0 : index
    %12 = vector.load %arg4[%c0_7, %c0_8, %c0_9] : memref<1x2x128xf32, #tpu.memory_space<vmem>>, vector<1x2x128xf32>
    tpu.vector_store %arg4[%c0_7, %c0_8, %c0_9], %11 {strides = array<i32>} : memref<1x2x128xf32, #tpu.memory_space<vmem>>, vector<1x2x128xf32>,
    return
  }
  func.func @transform_0(%arg0: i32) -> (i32, i32) {
    %c0_i32 = arith.constant 0 : i32
    %c0_i32_0 = arith.constant 0 : i32
    return %arg0, %c0_i32 : i32, i32
  }
  func.func @transform_1(%arg0: i32) -> (i32, i32) {
    %c0_i32 = arith.constant 0 : i32
    %c0_i32_0 = arith.constant 0 : i32
    %c0_i32_1 = arith.constant 0 : i32
    return %c0_i32, %c0_i32_0 : i32, i32
  }
  func.func @transform_2(%arg0: i32) -> (i32, i32) {
    %c0_i32 = arith.constant 0 : i32
    %c0_i32_0 = arith.constant 0 : i32
    return %arg0, %c0_i32 : i32, i32
  }
  func.func @transform_3(%arg0: i32) -> (i32, i32, i32) {
    %c0_i32 = arith.constant 0 : i32
    %c0_i32_0 = arith.constant 0 : i32
    %c0_i32_1 = arith.constant 0 : i32
    return %arg0, %c0_i32, %c0_i32_0 : i32, i32, i32
  }
}

</mosaic_0001>

<bundles_post_ra>
// kernel: tpu_custom_call.1
= control target key start
LH: loop header
LB: loop body
LE: loop exit
PB: predicated region body
PF: predicated region fallthrough
CT: control target
= control target key end

     0   :  { %9 = vsyncpa [#allocation3], 0  ;;  %s1195_s0 = inlined_call_operand.vmem [shape: bf16[512,48], index: 0, kind: input, shape index: {}]   ;;  %s1196_s1 = inlined_call_operand.vmem [shape: bf16[48,128], index: 1, kind: input, shape index: {}]   ;;  %s1197_s2 = inlined_call_operand.hbm [shape: bf16[512,128], index: 2, kind: output, shape index: {0}]   ;;  %s1198_s3 = inlined_call_operand.hbm [shape: f32[4,2,128], index: 3, kind: output, shape index: {1}]  }
   0x1   :  { %11 = vsyncpa [#allocation3 + $0x1], 0 }
   0x2   :  { %12 = vsyncpa [#allocation5], 0 }
   0x3   :  { %14 = vsyncpa [#allocation5 + $0x1], 0  ;;  %s983_s12 = smov 0   ;;  %s985_s13 = smov 0  }
   0x4   :  { %s987_s14 = smov 0   ;;  %s989_s15 = smov 0  }
   0x5 LB: > { %s1004_s16 = sadd.s32 4294967295, %s957_s15   ;;  %s653_s17 = sadd.s32 4294967294, %s957_s15   ;;  %s957_s15 = sphi %s989_s15, %s1204_s15   ;;  %s953_s14 = sphi %s987_s14, %s1203_s14   ;;  %s949_s13 = sphi %s985_s13, %s1202_s13   ;;  %s945_s12 = sphi %s983_s12, %s1201_s12  }
   0x6   : > { %s1008_s18 = sadd.s32 1, %s957_s15   ;;  %s74_s19 = sadd.s32 1, %s953_s14 }
   0x7   : > { %s71_s20 = ssub.s32 %s957_s15, %s1008_s18  ;;  %p84_p0 = scmp.ne.s32.totalorder %s953_s14, %s949_s13 }
   0x8   : > { %p72_p1 = scmp.eq.s32.totalorder %s71_s20, 0  ;;  %p85_p2 = scmp.eq.s32.totalorder %s1004_s16, 3 }
   0x9   : > { %p90_p3 = scmp.ne.s32.totalorder %s949_s13, %s945_s12  ;;  %p91_p4 = scmp.eq.s32.totalorder %s653_s17, 3 }
   0xa   : > { %s1019_s21 = scalar_select %p72_p1, %s953_s14, %s74_s19  }
   0xb   : > { %p1021_p5 = por %p85_p2, %p84_p0  ;;  %p1025_p6 = por %p91_p4, %p90_p3 }
   0xc   : > { %p656_p7 = scmp.ge.s32.totalorder %s957_s15, 1  ;;  %p147_p8 = scmp.lt.s32.totalorder %s957_s15, 5 }
   0xe   : > { %p148_p9 = pnand %p656_p7, %p147_p8 }
   0xf   : > { %v852_v0 = vld [vmem:[%s1196_s1] sm:$0xff] (!%p148_p9)   ;;  %s659_s26 = sshll.u32 (!%p148_p9), %s1004_s16, 4  ;;  %v853_v1 = vld [vmem:[%s1196_s1 + $0x8] sm:$0xff] (!%p148_p9)   ;;  %v854_v2 = vld [vmem:[%s1196_s1 + $0x10] sm:$0xff] (!%p148_p9)   ;;  %vm264_vm0 = vcmask (!%p148_p9), 392192   ;;  %s1053_s8 = sand.u32 (!%p148_p9), 1, %s949_s13  }
  0x10   : > { %151 = sbr.rel (%p148_p9) target bundleno = 314 (0x13a), region = 28  ;;  %p177_p10 = scmp.lt.s32.totalorder (!%p148_p9), %s659_s26, 63  ;;  %778 = vmatprep.subr.bf16.mxu0 (!%p148_p9), %v852_v0  ;;  %800 = vmatprep.subr.bf16.mxu1 (!%p148_p9), %v852_v0 }
  0x11   : > { %779 = vmatpush3.bf16.msra.mxu0 (!%p148_p9), %v852_v0  ;;  %803 = vmatpush3.bf16.msra.mxu1 (!%p148_p9), %v852_v0  ;;  %s657_s9 = sshll.u32 (!%p148_p9), %s1053_s8, 6  ;;  %s719_s11 = sshll.u32 (!%p148_p9), %s1004_s16, 10 }
  0x12   : > { %780 = vmatprep.subr.bf16.mxu0 (!%p148_p9), %v853_v1  ;;  %801 = vmatprep.subr.bf16.mxu1 (!%p148_p9), %v853_v1  ;;  %s1068_s10 = scalar_lea.vmem (!%p148_p9), [#allocation2], %s657_s9  ;;  %s1089_s24 = scalar_lea.hbm (!%p148_p9), %s1197_s2, %s719_s11 }
  0x13   : > { %s546_s17 = sshll.u32 (!%p148_p9), %s1068_s10, 4  ;;  %s528_s25 = scalar_lea.sflag (!%p148_p9), [#allocation3], %s1053_s8  ;;  %s1091_s17 = int_to_ptr.vmem [resolvable:$true] %s546_s17 }
  0x14   : > { %s959_s27 = smov (!%p148_p9), [#allocation2]  }
  0x15   : > { %781 = vmatpush3.bf16.msra.mxu0 (!%p148_p9), %v853_v1  ;;  %804 = vmatpush3.bf16.msra.mxu1 (!%p148_p9), %v853_v1  ;;  %s867_s28 = sshll.u32 (!%p148_p9), %s959_s27, 4  ;;  %s868_s28 = int_to_ptr.vmem [resolvable:$false] %s867_s28 }
  0x16   : > { %782 = vmatprep.subr.bf16.mxu0 (!%p148_p9), %v854_v2  ;;  %802 = vmatprep.subr.bf16.mxu1 (!%p148_p9), %v854_v2  ;;  %s869_s29 = scalar_lea.vmem (!%p148_p9), %s868_s28, 2048  ;;  %p870_p0 = scmp.lt.s32.totalorder (!%p148_p9), %s1091_s17, %s868_s28 }
  0x17   : > { %s1206_s26 = smov (!%p177_p10, %s659_s26), 63 }
  0x18   : > { %s660_s4 = sshll.u32 %s1206_s26, 2  ;;  %s863_s26 = scalar_lea.vmem %s1091_s17, 1024 }
  0x19   : > { %s180_s7 = scalar_lea.vmem %s1195_s0, %s660_s4  ;;  %783 = vmatpush3.bf16.msra.mxu0 %v854_v2  ;;  %805 = vmatpush3.bf16.msra.mxu1 %v854_v2  ;;  %p864_p11 = scmp.ne.s32.totalorder %s1091_s17, %s863_s26 }
  0x1a   : > { %v855_v3 = vld [vmem:[%s180_s7] sm:$0xff]   ;;  %v856_v4 = vld [vmem:[%s180_s7 + $0x8] sm:$0xff]   ;;  %v857_v5 = vld [vmem:[%s180_s7 + $0x10] sm:$0xff]   ;;  %p871_p1 = scmp.lt.s32.totalorder %s869_s29, %s863_s26 }
  0x1b   : > { %784 = vmatprep.mubr.msk.bf16.mxu0 %vm264_vm0, %v855_v3  ;;  %v859_v6 = vld [vmem:[%s180_s7 + $0x20] sm:$0xff]   ;;  %v860_v7 = vld [vmem:[%s180_s7 + $0x28] sm:$0xff]   ;;  %v861_v8 = vld [vmem:[%s180_s7 + $0x30] sm:$0xff]   ;;  %p865_p12 = pnand %p864_p11, %p1021_p5 }
  0x1c   : > { %792 = vmatprep.mubr.msk.bf16.mxu1 %vm264_vm0, %v859_v6  ;;  %785 = vmatmul.mubr.msk.bf16.vlgmr.msra.gmra.mrb[0].mxu0 %vm264_vm0, %v856_v4  ;;  %v858_v9 = vld [vmem:[%s180_s7 + $0x18] sm:$0xff]   ;;  %p872_p2 = por %p871_p1, %p870_p0 }
  0x1d   : > { %793 = vmatmul.mubr.msk.bf16.vlgmr.msra.gmra.mrb[0].mxu1 %vm264_vm0, %v860_v7  ;;  %788 = vmatprep.mubr.msk.bf16.mxu0 %vm264_vm0, %v857_v5  ;;  %v862_v10 = vld [vmem:[%s180_s7 + $0x38] sm:$0xff]   ;;  %p866_p13 = pneg %p865_p12 }
  0x1e   : > { %796 = vmatprep.mubr.msk.bf16.mxu1 %vm264_vm0, %v861_v8 }
  0x1f   : > { %p873_p3 = pnand %p872_p2, %p866_p13 }
  0x24   : > { %789 = vmatmul.mubr.msk.bf16.gmra.mrb[4].mxu0 %vm264_vm0, %v858_v9 }
  0x25   : > { %797 = vmatmul.mubr.msk.bf16.gmra.mrb[4].mxu1 %vm264_vm0, %v862_v10 }
  0xef   : > { %v786_v11 = vpop.f32.mrb[0].mxu0 }
  0xf0   : > { %v1056_v12 = vpop.f32.mrb[0].mxu1  ;;  %v323_v13 = vpop.f32.mrb[1].mxu0  ;;  %v489_v26 = vmul.f32 %v786_v11, %v786_v11 }
  0xf1   : > { %v1058_v14 = vpop.f32.mrb[1].mxu1  ;;  %v787_v15 = vpop.f32.mrb[2].mxu0  ;;  %v487_v17 = vmul.f32 %v323_v13, %v323_v13 }
  0xf2   : > { %v1060_v16 = vpop.f32.mrb[2].mxu1  ;;  %v728_v18 = vpack.c.bf16 %v787_v15, %v786_v11  ;;  %v326_v19 = vpop.f32.mrb[3].mxu0  ;;  %v490_v29 = vmul.f32 %v787_v15, %v787_v15  ;;  %v495_v56 = vmul.f32 %v1058_v14, %v1058_v14 }
  0xf3   : > { %v748_v20 = vpack.c.bf16 %v1060_v16, %v1056_v12  ;;  %v1064_v21 = vpop.f32.mrb[3].mxu1  ;;  %v723_v22 = vpack.c.bf16 %v326_v19, %v323_v13  ;;  %v466_v23 = vadd.f32 %v326_v19, %v323_v13  ;;  %v488_v24 = vmul.f32 %v326_v19, %v326_v19 }
  0xf4   : > { %v743_v25 = vpack.c.bf16 %v1064_v21, %v1058_v14  ;;  %760 = vst [vmem:[%s1068_s10 + $0x8] sm:$0xff] %v728_v18  }
  0xf5   : > { %764 = vst [vmem:[%s1068_s10 + $0x28] sm:$0xff] %v748_v20   ;;  %724 = vst [vmem:[%s1068_s10] sm:$0xff] %v723_v22   ;;  %v467_v27 = vadd.f32 %v786_v11, %v466_v23  ;;  %v503_v28 = vadd.f32 %v488_v24, %v487_v17 }
  0xf6   : > { %763 = vst [vmem:[%s1068_s10 + $0x20] sm:$0xff] %v743_v25  }
  0xf7   : > { %v504_v30 = vadd.f32 %v503_v28, %v489_v26  ;;  %v790_v31 = vpop.f32.mrb[4].mxu0  ;;  %v468_v32 = vadd.f32 %v787_v15, %v467_v27 }
  0xf8   : > { %v1074_v33 = vpop.f32.mrb[4].mxu1  ;;  %v339_v34 = vpop.f32.mrb[5].mxu0  ;;  %v493_v50 = vmul.f32 %v790_v31, %v790_v31 }
  0xf9   : > { %v1076_v35 = vpop.f32.mrb[5].mxu1  ;;  %v469_v36 = vadd.f32 %v468_v32, %v339_v34  ;;  %v491_v37 = vmul.f32 %v339_v34, %v339_v34  ;;  %v505_v38 = vadd.f32 %v504_v30, %v490_v29  ;;  %v791_v39 = vpop.f32.mrb[6].mxu0 }
  0xfa   : > { %v1080_v40 = vpop.f32.mrb[6].mxu1  ;;  %v738_v41 = vpack.c.bf16 %v791_v39, %v790_v31  ;;  %v342_v42 = vpop.f32.mrb[7].mxu0  ;;  %v494_v53 = vmul.f32 %v791_v39, %v791_v39 }
  0xfb   : > { %v758_v43 = vpack.c.bf16 %v1080_v40, %v1074_v33  ;;  %v1084_v44 = vpop.f32.mrb[7].mxu1  ;;  %v506_v45 = vadd.f32 %v505_v38, %v491_v37  ;;  %v733_v46 = vpack.c.bf16 %v342_v42, %v339_v34  ;;  %v470_v47 = vadd.f32 %v469_v36, %v342_v42 }
  0xfc   : > { %v492_v48 = vmul.f32 %v342_v42, %v342_v42  ;;  %762 = vst [vmem:[%s1068_s10 + $0x18] sm:$0xff] %v738_v41   ;;  %v753_v49 = vpack.c.bf16 %v1084_v44, %v1076_v35 }
  0xfd   : > { %766 = vst [vmem:[%s1068_s10 + $0x38] sm:$0xff] %v758_v43   ;;  %761 = vst [vmem:[%s1068_s10 + $0x10] sm:$0xff] %v733_v46   ;;  %v471_v51 = vadd.f32 %v790_v31, %v470_v47 }
  0xfe   : > { %v507_v52 = vadd.f32 %v506_v45, %v492_v48  ;;  %765 = vst [vmem:[%s1068_s10 + $0x30] sm:$0xff] %v753_v49  }
  0xff   : > { %v472_v55 = vadd.f32 %v791_v39, %v471_v51 }
 0x100   : > { %v508_v54 = vadd.f32 %v507_v52, %v493_v50 }
 0x101   : > { %876 = shalt.err (!%p873_p3)
}
 0x102   : > { %s877_s30 = scalar_lea.hbm %s1089_s24, 1024  ;;  %s881_s6 = scalar_lea.hbm %s1197_s2, 4096 }
 0x103   : > { %p878_p4 = scmp.ne.s32.totalorder %s1089_s24, %s877_s30  ;;  %p882_p9 = scmp.lt.u32.totalorder %s1089_s24, %s1197_s2 }
 0x104   : > { %p883_p10 = scmp.lt.u32.totalorder %s881_s6, %s877_s30  ;;  %p885_p12 = scmp.lt.u32.totalorder %s877_s30, %s1089_s24 }
 0x105   : > { %p879_p7 = pnand %p878_p4, %p1021_p5 }
 0x106   : > { %p884_p11 = por %p883_p10, %p882_p9 }
 0x107   : > { %p880_p8 = pneg %p879_p7 }
 0x108   : > { %p886_p13 = por %p885_p12, %p884_p11 }
 0x10a   : > { %p887_p0 = pnand %p886_p13, %p880_p8 }
 0x10c   : > { %890 = shalt.err (!%p887_p0)
}
 0x10d   : > { %s960_s10 = smov 64   ;;  %s961_s11 = smov 4   ;;  %v473_v57 = vadd.f32 %v472_v55, %v1058_v14  ;;  %v509_v58 = vadd.f32 %v508_v54, %v494_v53  ;;  %v496_v61 = vmul.f32 %v1064_v21, %v1064_v21  ;;  %v497_v62 = vmul.f32 %v1056_v12, %v1056_v12 }
 0x10e   : > { %806 = dma.vmem_to_hbm [thread:$0]  (%p1021_p5), %s1091_s17, 1024, %s1089_s24, %s528_s25, %s960_s10, %s960_s10, %s961_s11   ;;  %v498_v1 = vmul.f32 %v1060_v16, %v1060_v16  ;;  %v499_v4 = vmul.f32 %v1076_v35, %v1076_v35  ;;  %v500_v9 = vmul.f32 %v1084_v44, %v1084_v44  ;;  %v501_v10 = vmul.f32 %v1074_v33, %v1074_v33 }
 0x10f   : > { %v510_v59 = vadd.f32 %v509_v58, %v495_v56  ;;  %v474_v60 = vadd.f32 %v473_v57, %v1064_v21  ;;  %v502_v13 = vmul.f32 %v1080_v40, %v1080_v40  ;;  %s658_s17 = sshll.u32 %s1053_s8, 1  ;;  %s700_s19 = sshll.u32 %s1004_s16, 5  ;;  %vm524_vm1 = vcmask 1040384  }
 0x110   : > { %s175_s20 = scalar_lea.vmem [#allocation4], %s658_s17  ;;  %s1152_s27 = scalar_lea.hbm %s1198_s3, %s700_s19 }
 0x111   : > { %v475_v63 = vadd.f32 %v1056_v12, %v474_v60  ;;  %v511_v0 = vadd.f32 %v510_v59, %v496_v61  ;;  %s562_s24 = sshll.u32 %s175_s20, 4  ;;  %s533_s28 = scalar_lea.sflag [#allocation5], %s1053_s8  ;;  %s1154_s24 = int_to_ptr.vmem [resolvable:$true] %s562_s24 }
 0x112   : > { %s891_s29 = scalar_lea.vmem %s1154_s24, 32  ;;  %s962_s16 = smov [#allocation4]  }
 0x113   : > { %v512_v2 = vadd.f32 %v511_v0, %v497_v62  ;;  %v476_v3 = vadd.f32 %v1060_v16, %v475_v63  ;;  %p892_p1 = scmp.ne.s32.totalorder %s1154_s24, %s891_s29  ;;  %s895_s30 = sshll.u32 %s962_s16, 4  ;;  %s896_s30 = int_to_ptr.vmem [resolvable:$false] %s895_s30 }
 0x114   : > { %s897_s4 = scalar_lea.vmem %s896_s30, 64  ;;  %p898_p4 = scmp.lt.s32.totalorder %s1154_s24, %s896_s30 }
 0x115   : > { %v477_v5 = vadd.f32 %v476_v3, %v1076_v35  ;;  %v513_v6 = vadd.f32 %v512_v2, %v498_v1  ;;  %p893_p2 = pnand %p892_p1, %p1021_p5  ;;  %p899_p7 = scmp.lt.s32.totalorder %s897_s4, %s891_s29 }
 0x117   : > { %v514_v7 = vadd.f32 %v513_v6, %v499_v4  ;;  %v478_v8 = vadd.f32 %v477_v5, %v1084_v44  ;;  %p894_p3 = pneg %p893_p2  ;;  %p900_p8 = por %p899_p7, %p898_p4 }
 0x119   : > { %v479_v11 = vadd.f32 %v1074_v33, %v478_v8  ;;  %v515_v12 = vadd.f32 %v514_v7, %v500_v9  ;;  %p901_p9 = pnand %p900_p8, %p894_p3 }
 0x11b   : > { %v480_v14 = vadd.f32 %v1080_v40, %v479_v11  ;;  %v516_v15 = vadd.f32 %v515_v12, %v501_v10 }
 0x11d   : > { %v481_v16 = vrot.slane %v480_v14, 4  ;;  %v517_v17 = vadd.f32 %v516_v15, %v502_v13 }
 0x11f   : > { %v482_v18 = vadd.f32 %v481_v16, %v480_v14  ;;  %v518_v19 = vrot.slane %v517_v17, 4 }
 0x121   : > { %v483_v20 = vrot.slane %v482_v18, 2  ;;  %v519_v21 = vadd.f32 %v518_v19, %v517_v17 }
 0x123   : > { %v484_v22 = vadd.f32 %v483_v20, %v482_v18  ;;  %v520_v23 = vrot.slane %v519_v21, 2 }
 0x125   : > { %v485_v24 = vrot.slane %v484_v22, 1  ;;  %v521_v25 = vadd.f32 %v520_v23, %v519_v21 }
 0x127   : > { %v522_v26 = vrot.slane %v521_v25, 1  ;;  %v486_v27 = vadd.f32 %v485_v24, %v484_v22 }
 0x129   : > { %v523_v28 = vadd.f32 %v522_v26, %v521_v25 }
 0x12b   : > { %v525_v29 = vsel %vm524_vm1, %v486_v27, %v523_v28 }
 0x12c   : > { %526 = vst [vmem:[%s175_s20] sm:$0x3] %v525_v29 }
 0x12d   : > { %904 = shalt.err (!%p901_p9)
}
 0x12e   : > { %s905_s8 = scalar_lea.hbm %s1152_s27, 32  ;;  %s909_s7 = scalar_lea.hbm %s1198_s3, 128 }
 0x12f   : > { %p906_p10 = scmp.ne.s32.totalorder %s1152_s27, %s905_s8  ;;  %p910_p13 = scmp.lt.u32.totalorder %s1152_s27, %s1198_s3 }
 0x130   : > { %p911_p0 = scmp.lt.u32.totalorder %s909_s7, %s905_s8  ;;  %p913_p2 = scmp.lt.u32.totalorder %s905_s8, %s1152_s27 }
 0x131   : > { %p907_p11 = pnand %p906_p10, %p1021_p5 }
 0x132   : > { %p912_p1 = por %p911_p0, %p910_p13 }
 0x133   : > { %p908_p12 = pneg %p907_p11 }
 0x134   : > { %p914_p3 = por %p913_p2, %p912_p1 }
 0x136   : > { %p915_p4 = pnand %p914_p3, %p908_p12 }
 0x138   : > { %918 = shalt.err (!%p915_p4)
}
 0x139   : > { %807 = dma.vmem_to_hbm [thread:$0]  (%p1021_p5), %s1154_s24, 32, %s1152_s27, %s533_s28  }
 0x13a PF: > { %p817_p7 = scmp.ge.s32.totalorder %s957_s15, 2  ;;  %s574_s11 = sand.u32 1, %s945_s12  }
 0x13b   : > { %s575_s17 = scalar_lea.sflag [#allocation3], %s574_s11 }
 0x13c   : > { %p811_p8 = pnand %p817_p7, %p1025_p6 }
 0x13e   : > { %936 = dma.done.wait (!%p811_p8), %s575_s17, 1024  }
 0x13f   : > { %938 = vsyncadd (!%p811_p8), %s575_s17, 4294966272  ;;  %s584_s19 = scalar_lea.sflag [#allocation5], %s574_s11 }
 0x140   : > { %940 = dma.done.wait (!%p811_p8), %s584_s19, 32  }
 0x141   : > { %942 = vsyncadd (!%p811_p8), %s584_s19, 4294967264  ;;  %p17_p5 = scmp.ge.s32.totalorder %s1008_s18, 6   ;;  %s1201_s12 = smov %s949_s13 }
 0x142   : > { %s1202_s13 = smov %s953_s14  ;;  %s1203_s14 = smov %s1019_s21 }
 0x143   : > { %s1204_s15 = smov %s1008_s18  ;;  %19 = sbr.rel (!%p17_p5) target bundleno = 5 (0x5), region = 80 }
 0x14a   :  { %589 = vsyncpa [#allocation3], 1 }
 0x14b   :  { %591 = vsyncpa [#allocation3 + $0x1], 1 }
 0x14c   :  { %592 = vsyncpa [#allocation5], 1 }
 0x14d   :  { %594 = vsyncpa [#allocation5 + $0x1], 1 }

</bundles_post_ra>
